<compile_context>
chip_gen: v7x
topology: tpu7x:2x2x1
jax: 0.10.0
libtpu: 0.0.40
codegen_flags: <defaults>
</compile_context>

<pallas_src>
import functools

import jax
import jax.numpy as jnp
from jax.experimental import pallas as pl
from jax.experimental.pallas import tpu as pltpu

IN_F = 768
H1_F = 128
H2_F = 64
OUT_F = 8

MAX_TILE_B = 1024   # batch rows per grid step for large batches (~3 MiB f32 x block per buffer)
SUB_B = 256         # rows per inner sub-chunk: fills the 256-row MXU M dim on v6e/v7x


def _round_up(n, m):
    return ((n + m - 1) // m) * m


def _choose_tiles(batch):
    """Pick (tile_b, sub_b) with tile_b % sub_b == 0 and tile_b % 8 == 0."""
    if batch > MAX_TILE_B:
        return MAX_TILE_B, SUB_B
    # Whole batch fits in <= MAX_TILE_B rows: use >=2 grid steps when there is enough work
    # so both TensorCores participate on v7x; tiny batches use a single small tile.
    steps = 2 if batch > 2 * SUB_B else 1
    tile_b = _round_up(-(-batch // steps), 8)
    sub_b = min(SUB_B, tile_b)
    tile_b = _round_up(tile_b, sub_b)
    return tile_b, sub_b


def mlp_kernel(x_ref, w1_ref, b1_ref, w2_ref, b2_ref, w3_ref, b3_ref, o_ref, *, sub_b, n_sub):
    # Resident weights/biases: read once per grid step (constant index_map -> single DMA).
    w1 = w1_ref[...]          # (768, 128) bf16
    b1 = b1_ref[...]          # (1, 128)   f32
    w2 = w2_ref[...]          # (128, 64)  bf16
    b2 = b2_ref[...]          # (1, 64)    f32
    w3 = w3_ref[...]          # (64, 8)    bf16
    b3 = b3_ref[...]          # (1, 8)     f32

    def body(i, carry):
        off = pl.multiple_of(i * sub_b, sub_b)
        # In-kernel f32 -> bf16 cast of the x sub-chunk (no wrapper-side HBM pass).
        xb = x_ref[pl.ds(off, sub_b), :].astype(jnp.bfloat16)                 # (sub_b, 768)
        # fc1 + ReLU (bf16 MXU, f32 accumulation)
        h1 = jnp.dot(xb, w1, preferred_element_type=jnp.float32) + b1
        h1 = jnp.maximum(h1, 0.0).astype(jnp.bfloat16)                        # (sub_b, 128)
        # fc2 + ReLU
        h2 = jnp.dot(h1, w2, preferred_element_type=jnp.float32) + b2
        h2 = jnp.maximum(h2, 0.0).astype(jnp.bfloat16)                        # (sub_b, 64)
        # fc3 (no activation) — unpadded 8-wide output block
        out = jnp.dot(h2, w3, preferred_element_type=jnp.float32) + b3        # (sub_b, 8)
        o_ref[pl.ds(off, sub_b), :] = out.astype(o_ref.dtype)
        return carry

    jax.lax.fori_loop(0, n_sub, body, 0, unroll=True)


def eight_class_model_forward(x, params):
    """x: (B, 768) float32. params: pre-transposed (in, out) weights and (1, out) biases."""
    B = x.shape[0]
    tile_b, sub_b = _choose_tiles(B)
    nb = pl.cdiv(B, tile_b)   # last block may be partial: OOB rows are garbage, never written back

    # Weight casts are tiny one-off ops (<0.5 MiB total); biases stay f32 for the accumulate.
    w1b = params["w1"].astype(jnp.bfloat16)
    w2b = params["w2"].astype(jnp.bfloat16)
    w3b = params["w3"].astype(jnp.bfloat16)

    const = lambda shape: pl.BlockSpec(shape, lambda i: (0,) * len(shape))

    kernel = functools.partial(mlp_kernel, sub_b=sub_b, n_sub=tile_b // sub_b)

    out = pl.pallas_call(
        kernel,
        out_shape=jax.ShapeDtypeStruct((B, OUT_F), jnp.float32),
        grid=(nb,),
        in_specs=[
            pl.BlockSpec((tile_b, IN_F), lambda i: (i, 0)),   # x: streamed f32 per grid step
            const((IN_F, H1_F)), const((1, H1_F)),            # w1, b1 (resident)
            const((H1_F, H2_F)), const((1, H2_F)),            # w2, b2 (resident)
            const((H2_F, OUT_F)), const((1, OUT_F)),          # w3, b3 (resident, unpadded)
        ],
        out_specs=pl.BlockSpec((tile_b, OUT_F), lambda i: (i, 0)),
        compiler_params=pltpu.CompilerParams(
            dimension_semantics=("parallel",),                # shard batch across TCs
        ),
    )(x, w1b, params["b1"], w2b, params["b2"], w3b, params["b3"])

    return out


def init_params(key):
    """Deterministic init mimicking PyTorch nn.Linear default (U[-1/sqrt(fan_in), +1/sqrt(fan_in)])."""
    def linear(key, fan_in, fan_out):
        kw, kb = jax.random.split(key)
        bound = 1.0 / jnp.sqrt(jnp.float32(fan_in))
        # Stored pre-transposed: (in, out) so kernel computes y = x @ W + b (== PyTorch x @ W^T + b).
        w = jax.random.uniform(kw, (fan_in, fan_out), jnp.float32, -bound, bound)
        b = jax.random.uniform(kb, (1, fan_out), jnp.float32, -bound, bound)
        return w, b

    k1, k2, k3 = jax.random.split(key, 3)
    w1, b1 = linear(k1, IN_F, H1_F)
    w2, b2 = linear(k2, H1_F, H2_F)
    w3, b3 = linear(k3, H2_F, OUT_F)
    return {"w1": w1, "b1": b1, "w2": w2, "b2": b2, "w3": w3, "b3": b3}


def reference_forward_matched(x, p):
    """Pure-JAX reference matching the kernel's numerics (bf16 MXU inputs, f32 accumulation)."""
    h1 = jnp.dot(x.astype(jnp.bfloat16), p["w1"].astype(jnp.bfloat16),
                 preferred_element_type=jnp.float32) + p["b1"]
    h1 = jnp.maximum(h1, 0.0).astype(jnp.bfloat16)
    h2 = jnp.dot(h1, p["w2"].astype(jnp.bfloat16),
                 preferred_element_type=jnp.float32) + p["b2"]
    h2 = jnp.maximum(h2, 0.0).astype(jnp.bfloat16)
    return jnp.dot(h2, p["w3"].astype(jnp.bfloat16),
                   preferred_element_type=jnp.float32) + p["b3"]


def reference_forward_f32(x, p):
    """Pure-f32 reference: the original PyTorch EightClassModel math."""
    h1 = jnp.maximum(jnp.dot(x, p["w1"], preferred_element_type=jnp.float32) + p["b1"], 0.0)
    h2 = jnp.maximum(jnp.dot(h1, p["w2"], preferred_element_type=jnp.float32) + p["b2"], 0.0)
    return jnp.dot(h2, p["w3"], preferred_element_type=jnp.float32) + p["b3"]


if __name__ == "__main__":
    key = jax.random.PRNGKey(0)
    kx, kp = jax.random.split(key)

    B = 8  # small test batch; tile chooser collapses to a single (8, 768) tile
    x = jax.random.normal(kx, (B, IN_F), jnp.float32)
    params = init_params(kp)

    fwd = jax.jit(eight_class_model_forward)
    out = jax.block_until_ready(fwd(x, params))
    assert out.shape == (B, OUT_F), f"bad shape {out.shape}"

    # Tight check against a reference matching the kernel's bf16-MXU numerics ...
    ref_matched = reference_forward_matched(x, params)
    assert jnp.allclose(out, ref_matched, atol=1e-3, rtol=1e-3), "mismatch vs bf16-matched reference"
    # ... and a looser check against the original all-f32 model math (bf16 rounding ~1e-2 logits).
    ref_f32 = reference_forward_f32(x, params)
    assert jnp.allclose(out, ref_f32, atol=5e-2, rtol=5e-2), "mismatch vs f32 reference"

    print("KERNEL_OK")
</pallas_src>

<mosaic_0001>
module attributes {stable_mosaic.version = 11 : i64} {
  func.func @mlp_kernel(%arg0: i32, %arg1: memref<8x768xf32, #tpu.memory_space<vmem>>, %arg2: memref<768x128xbf16, #tpu.memory_space<vmem>>, %arg3: memref<1x128xf32, #tpu.memory_space<vmem>>, %arg4: memref<128x64xbf16, #tpu.memory_space<vmem>>, %arg5: memref<1x64xf32, #tpu.memory_space<vmem>>, %arg6: memref<64x8xbf16, #tpu.memory_space<vmem>>, %arg7: memref<1x8xf32, #tpu.memory_space<vmem>>, %arg8: memref<8x8xf32, #tpu.memory_space<vmem>>) attributes {dimension_semantics = [#tpu.dimension_semantics<parallel>], iteration_bounds = array<i64: 1>, scalar_prefetch = 0 : i64, scratch_operands = 0 : i64, tpu.core_type = #tpu.core_type<tc>, window_params = [{transform_indices = @transform_0, window_bounds = array<i64: 8, 768>}, {pipeline_mode = #tpu.pipeline_mode<synchronous>, transform_indices = @transform_1, window_bounds = array<i64: 768, 128>}, {pipeline_mode = #tpu.pipeline_mode<synchronous>, transform_indices = @transform_2, window_bounds = array<i64: 1, 128>}, {pipeline_mode = #tpu.pipeline_mode<synchronous>, transform_indices = @transform_3, window_bounds = array<i64: 128, 64>}, {pipeline_mode = #tpu.pipeline_mode<synchronous>, transform_indices = @transform_4, window_bounds = array<i64: 1, 64>}, {pipeline_mode = #tpu.pipeline_mode<synchronous>, transform_indices = @transform_5, window_bounds = array<i64: 64, 8>}, {pipeline_mode = #tpu.pipeline_mode<synchronous>, transform_indices = @transform_6, window_bounds = array<i64: 1, 8>}, {transform_indices = @transform_7, window_bounds = array<i64: 8, 8>}]} {
    %c0 = arith.constant 0 : index
    %c0_0 = arith.constant 0 : index
    %0 = vector.load %arg2[%c0, %c0_0] : memref<768x128xbf16, #tpu.memory_space<vmem>>, vector<768x128xbf16>
    %c0_1 = arith.constant 0 : index
    %c0_2 = arith.constant 0 : index
    %1 = vector.load %arg3[%c0_1, %c0_2] : memref<1x128xf32, #tpu.memory_space<vmem>>, vector<1x128xf32>
    %c0_3 = arith.constant 0 : index
    %c0_4 = arith.constant 0 : index
    %2 = vector.load %arg4[%c0_3, %c0_4] : memref<128x64xbf16, #tpu.memory_space<vmem>>, vector<128x64xbf16>
    %c0_5 = arith.constant 0 : index
    %c0_6 = arith.constant 0 : index
    %3 = vector.load %arg5[%c0_5, %c0_6] : memref<1x64xf32, #tpu.memory_space<vmem>>, vector<1x64xf32>
    %c0_7 = arith.constant 0 : index
    %c0_8 = arith.constant 0 : index
    %4 = vector.load %arg6[%c0_7, %c0_8] : memref<64x8xbf16, #tpu.memory_space<vmem>>, vector<64x8xbf16>
    %c0_9 = arith.constant 0 : index
    %c0_10 = arith.constant 0 : index
    %5 = vector.load %arg7[%c0_9, %c0_10] : memref<1x8xf32, #tpu.memory_space<vmem>>, vector<1x8xf32>
    %c0_i32 = arith.constant 0 : i32
    %c8_i32 = arith.constant 8 : i32
    %6 = arith.muli %c0_i32, %c8_i32 : i32
    %7 = tpu.assume_multiple %6, 8 : i32
    %8 = arith.index_cast %7 : i32 to index
    %c0_11 = arith.constant 0 : index
    %9 = vector.load %arg1[%8, %c0_11] : memref<8x768xf32, #tpu.memory_space<vmem>>, vector<8x768xf32>
    %10 = arith.truncf %9 : vector<8x768xf32> to vector<8x768xbf16>
    %cst = arith.constant dense<0.000000e+00> : vector<8x128xf32>
    %11 = tpu.matmul %10, %0, %cst {dimension_numbers = #tpu.dot_dimension_numbers<[1], [0], [0], [1], [0, 0, 1, 1], [], []>} : vector<8x768xbf16>, vector<768x128xbf16>, vector<8x128xf32> -> vector<8x128xf32>
    %12 = vector.broadcast %1 : vector<1x128xf32> to vector<8x128xf32>
    %13 = arith.addf %11, %12 : vector<8x128xf32>
    %cst_12 = arith.constant 0.000000e+00 : f32
    %14 = vector.broadcast %cst_12 : f32 to vector<8x128xf32>
    %15 = arith.maximumf %13, %14 : vector<8x128xf32>
    %16 = arith.truncf %15 : vector<8x128xf32> to vector<8x128xbf16>
    %cst_13 = arith.constant dense<0.000000e+00> : vector<8x64xf32>
    %17 = tpu.matmul %16, %2, %cst_13 {dimension_numbers = #tpu.dot_dimension_numbers<[1], [0], [0], [1], [0, 0, 1, 1], [], []>} : vector<8x128xbf16>, vector<128x64xbf16>, vector<8x64xf32> -> vector<8x64xf32>
    %18 = vector.broadcast %3 : vector<1x64xf32> to vector<8x64xf32>
    %19 = arith.addf %17, %18 : vector<8x64xf32>
    %cst_14 = arith.constant 0.000000e+00 : f32
    %20 = vector.broadcast %cst_14 : f32 to vector<8x64xf32>
    %21 = arith.maximumf %19, %20 : vector<8x64xf32>
    %22 = arith.truncf %21 : vector<8x64xf32> to vector<8x64xbf16>
    %cst_15 = arith.constant dense<0.000000e+00> : vector<8x8xf32>
    %23 = tpu.matmul %22, %4, %cst_15 {dimension_numbers = #tpu.dot_dimension_numbers<[1], [0], [0], [1], [0, 0, 1, 1], [], []>} : vector<8x64xbf16>, vector<64x8xbf16>, vector<8x8xf32> -> vector<8x8xf32>
    %24 = vector.broadcast %5 : vector<1x8xf32> to vector<8x8xf32>
    %25 = arith.addf %23, %24 : vector<8x8xf32>
    %26 = arith.index_cast %7 : i32 to index
    %c0_16 = arith.constant 0 : index
    %27 = vector.load %arg8[%26, %c0_16] : memref<8x8xf32, #tpu.memory_space<vmem>>, vector<8x8xf32>
    tpu.vector_store %arg8[%26, %c0_16], %25 {strides = array<i32>} : memref<8x8xf32, #tpu.memory_space<vmem>>, vector<8x8xf32>,
    %c1_i32 = arith.constant 1 : i32
    return
  }
  func.func @transform_0(%arg0: i32) -> (i32, i32) {
    %c0_i32 = arith.constant 0 : i32
    %c0_i32_0 = arith.constant 0 : i32
    return %arg0, %c0_i32 : i32, i32
  }
  func.func @transform_1(%arg0: i32) -> (i32, i32) {
    %c0_i32 = arith.constant 0 : i32
    %c0_i32_0 = arith.constant 0 : i32
    %c0_i32_1 = arith.constant 0 : i32
    return %c0_i32, %c0_i32_0 : i32, i32
  }
  func.func @transform_2(%arg0: i32) -> (i32, i32) {
    %c0_i32 = arith.constant 0 : i32
    %c0_i32_0 = arith.constant 0 : i32
    %c0_i32_1 = arith.constant 0 : i32
    return %c0_i32, %c0_i32_0 : i32, i32
  }
  func.func @transform_3(%arg0: i32) -> (i32, i32) {
    %c0_i32 = arith.constant 0 : i32
    %c0_i32_0 = arith.constant 0 : i32
    %c0_i32_1 = arith.constant 0 : i32
    return %c0_i32, %c0_i32_0 : i32, i32
  }
  func.func @transform_4(%arg0: i32) -> (i32, i32) {
    %c0_i32 = arith.constant 0 : i32
    %c0_i32_0 = arith.constant 0 : i32
    %c0_i32_1 = arith.constant 0 : i32
    return %c0_i32, %c0_i32_0 : i32, i32
  }
  func.func @transform_5(%arg0: i32) -> (i32, i32) {
    %c0_i32 = arith.constant 0 : i32
    %c0_i32_0 = arith.constant 0 : i32
    %c0_i32_1 = arith.constant 0 : i32
    return %c0_i32, %c0_i32_0 : i32, i32
  }
  func.func @transform_6(%arg0: i32) -> (i32, i32) {
    %c0_i32 = arith.constant 0 : i32
    %c0_i32_0 = arith.constant 0 : i32
    %c0_i32_1 = arith.constant 0 : i32
    return %c0_i32, %c0_i32_0 : i32, i32
  }
  func.func @transform_7(%arg0: i32) -> (i32, i32) {
    %c0_i32 = arith.constant 0 : i32
    %c0_i32_0 = arith.constant 0 : i32
    return %arg0, %c0_i32 : i32, i32
  }
}

</mosaic_0001>

<bundles_post_ra>
// kernel: eight_class_model_forward.1
= control target key start
LH: loop header
LB: loop body
LE: loop exit
PB: predicated region body
PF: predicated region fallthrough
CT: control target
= control target key end

     0   :  { %s1293_s0 = inlined_call_operand.vmem [shape: f32[8,768], index: 0, kind: input, shape index: {}]   ;;  %s1294_s1 = inlined_call_operand.vmem [shape: bf16[768,128], index: 1, kind: input, shape index: {}]   ;;  %s1295_s2 = inlined_call_operand.vmem [shape: f32[1,128], index: 2, kind: input, shape index: {}]   ;;  %s1296_s3 = inlined_call_operand.vmem [shape: bf16[128,64], index: 3, kind: input, shape index: {}]   ;;  %s1297_s4 = inlined_call_operand.vmem [shape: f32[1,64], index: 4, kind: input, shape index: {}]   ;;  %s1298_s5 = inlined_call_operand.vmem [shape: bf16[64,8], index: 5, kind: input, shape index: {}]   ;;  %s1299_s6 = inlined_call_operand.vmem [shape: f32[1,8], index: 6, kind: input, shape index: {}]   ;;  %s1300_s7 = inlined_call_operand.hbm [shape: f32[8,8], index: 7, kind: output, shape index: {}]  }
   0x1   :  { %v947_v0 = vld [vmem:[%s1294_s1 + $0x40] sm:$0xff]   ;;  %v951_v4 = vld [vmem:[%s1294_s1 + $0x48] sm:$0xff]   ;;  %v955_v8 = vld [vmem:[%s1294_s1 + $0x50] sm:$0xff]  }
   0x2   :  { %v948_v1 = vld [vmem:[%s1294_s1] sm:$0xff]   ;;  %832 = vmatprep.subr.bf16.mxu0 %v947_v0  ;;  %v952_v5 = vld [vmem:[%s1294_s1 + $0x8] sm:$0xff]   ;;  %v956_v9 = vld [vmem:[%s1294_s1 + $0x10] sm:$0xff]  }
   0x3   :  { %v949_v2 = vld [vmem:[%s1294_s1 + $0xc0] sm:$0xff]   ;;  %833 = vmatpush3.bf16.msra.mxu0 %v948_v1  ;;  %v953_v6 = vld [vmem:[%s1294_s1 + $0xc8] sm:$0xff]   ;;  %v957_v10 = vld [vmem:[%s1294_s1 + $0xd0] sm:$0xff]  }
   0x4   :  { %v950_v3 = vld [vmem:[%s1294_s1 + $0x80] sm:$0xff]   ;;  %854 = vmatprep.subr.bf16.mxu1 %v949_v2  ;;  %834 = vmatprep.subr.bf16.mxu0 %v951_v4  ;;  %v954_v7 = vld [vmem:[%s1294_s1 + $0x88] sm:$0xff]   ;;  %v958_v11 = vld [vmem:[%s1294_s1 + $0x90] sm:$0xff]  }
   0x5   :  { %855 = vmatpush3.bf16.msra.mxu1 %v950_v3  ;;  %v959_v12 = vld [vmem:[%s1294_s1 + $0x58] sm:$0xff]   ;;  %v963_v16 = vld [vmem:[%s1294_s1 + $0x60] sm:$0xff]   ;;  %v967_v20 = vld [vmem:[%s1294_s1 + $0x68] sm:$0xff]  }
   0x6   :  { %856 = vmatprep.subr.bf16.mxu1 %v953_v6  ;;  %v960_v13 = vld [vmem:[%s1294_s1 + $0x18] sm:$0xff]   ;;  %v964_v17 = vld [vmem:[%s1294_s1 + $0x20] sm:$0xff]   ;;  %v968_v21 = vld [vmem:[%s1294_s1 + $0x28] sm:$0xff]  }
   0x7   :  { %835 = vmatpush3.bf16.msra.mxu0 %v952_v5  ;;  %v961_v14 = vld [vmem:[%s1294_s1 + $0xd8] sm:$0xff]   ;;  %v965_v18 = vld [vmem:[%s1294_s1 + $0xe0] sm:$0xff]   ;;  %v969_v22 = vld [vmem:[%s1294_s1 + $0xe8] sm:$0xff]  }
   0x8   :  { %836 = vmatprep.subr.bf16.mxu0 %v955_v8  ;;  %v962_v15 = vld [vmem:[%s1294_s1 + $0x98] sm:$0xff]   ;;  %v966_v19 = vld [vmem:[%s1294_s1 + $0xa0] sm:$0xff]   ;;  %v970_v23 = vld [vmem:[%s1294_s1 + $0xa8] sm:$0xff]  }
   0x9   :  { %857 = vmatpush3.bf16.msra.mxu1 %v954_v7  ;;  %v971_v24 = vld [vmem:[%s1294_s1 + $0x70] sm:$0xff]   ;;  %v975_v28 = vld [vmem:[%s1294_s1 + $0x78] sm:$0xff]   ;;  %v155_v31 = vld [vmem:[%s1293_s0 + $0x8] sm:$0xff] }
   0xa   :  { %858 = vmatprep.subr.bf16.mxu1 %v957_v10  ;;  %v972_v25 = vld [vmem:[%s1294_s1 + $0x30] sm:$0xff]   ;;  %v976_v29 = vld [vmem:[%s1294_s1 + $0x38] sm:$0xff]   ;;  %v161_v32 = vpack.c.bf16 %v155_v31, %v155_v31  ;;  %v154_v34 = vld [vmem:[%s1293_s0] sm:$0xff] }
   0xb   :  { %837 = vmatpush3.bf16.msra.mxu0 %v956_v9  ;;  %v973_v26 = vld [vmem:[%s1294_s1 + $0xf0] sm:$0xff]   ;;  %v977_v30 = vld [vmem:[%s1294_s1 + $0xf8] sm:$0xff]   ;;  %v160_v35 = vpack.c.bf16 %v154_v34, %v154_v34  ;;  %v979_v36 = vld [vmem:[%s1294_s1 + $0x140] sm:$0xff]  }
   0xc   :  { %838 = vmatprep.subr.bf16.mxu0 %v959_v12  ;;  %v974_v27 = vld [vmem:[%s1294_s1 + $0xb0] sm:$0xff]   ;;  %v978_v33 = vld [vmem:[%s1294_s1 + $0xb8] sm:$0xff]   ;;  %492 = vmatprep.mubr.bf16.mxu0 %v161_v32  ;;  %v980_v39 = vld [vmem:[%s1294_s1 + $0x100] sm:$0xff]  }
   0xd   :  { %859 = vmatpush3.bf16.msra.mxu1 %v958_v11  ;;  %v157_v37 = vld [vmem:[%s1293_s0 + $0x18] sm:$0xff]  ;;  %v156_v40 = vld [vmem:[%s1293_s0 + $0x10] sm:$0xff]  ;;  %v981_v42 = vld [vmem:[%s1294_s1 + $0x148] sm:$0xff]  }
   0xe   :  { %860 = vmatprep.subr.bf16.mxu1 %v961_v14  ;;  %v163_v38 = vpack.c.bf16 %v157_v37, %v157_v37  ;;  %v162_v41 = vpack.c.bf16 %v156_v40, %v156_v40  ;;  %v982_v43 = vld [vmem:[%s1294_s1 + $0x108] sm:$0xff]   ;;  %v983_v44 = vld [vmem:[%s1294_s1 + $0x150] sm:$0xff]   ;;  %v985_v46 = vld [vmem:[%s1294_s1 + $0x158] sm:$0xff]  }
   0xf   :  { %839 = vmatpush3.bf16.msra.mxu0 %v960_v13  ;;  %v984_v45 = vld [vmem:[%s1294_s1 + $0x110] sm:$0xff]   ;;  %v986_v47 = vld [vmem:[%s1294_s1 + $0x118] sm:$0xff]   ;;  %v987_v48 = vld [vmem:[%s1294_s1 + $0x160] sm:$0xff]  }
  0x10   :  { %840 = vmatprep.subr.bf16.mxu0 %v963_v16  ;;  %532 = vmatprep.mubr.bf16.mxu1 %v163_v38  ;;  %v988_v49 = vld [vmem:[%s1294_s1 + $0x120] sm:$0xff]   ;;  %v989_v50 = vld [vmem:[%s1294_s1 + $0x168] sm:$0xff]   ;;  %v991_v54 = vld [vmem:[%s1294_s1 + $0x170] sm:$0xff]  }
  0x11   :  { %861 = vmatpush3.bf16.msra.mxu1 %v962_v15  ;;  %v159_v51 = vld [vmem:[%s1293_s0 + $0x28] sm:$0xff]  ;;  %v992_v55 = vld [vmem:[%s1294_s1 + $0x130] sm:$0xff]   ;;  %v993_v56 = vld [vmem:[%s1294_s1 + $0x178] sm:$0xff]  }
  0x12   :  { %862 = vmatprep.subr.bf16.mxu1 %v965_v18  ;;  %v990_v52 = vld [vmem:[%s1294_s1 + $0x128] sm:$0xff]   ;;  %v165_v53 = vpack.c.bf16 %v159_v51, %v159_v51 }
  0x13   :  { %841 = vmatpush3.bf16.msra.mxu0 %v964_v17 }
  0x14   :  { %842 = vmatprep.subr.bf16.mxu0 %v967_v20 }
  0x15   :  { %863 = vmatpush3.bf16.msra.mxu1 %v966_v19 }
  0x16   :  { %864 = vmatprep.subr.bf16.mxu1 %v969_v22 }
  0x17   :  { %843 = vmatpush3.bf16.msra.mxu0 %v968_v21 }
  0x18   :  { %844 = vmatprep.subr.bf16.mxu0 %v971_v24 }
  0x19   :  { %865 = vmatpush3.bf16.msra.mxu1 %v970_v23 }
  0x1a   :  { %866 = vmatprep.subr.bf16.mxu1 %v973_v26 }
  0x1b   :  { %845 = vmatpush3.bf16.msra.mxu0 %v972_v25 }
  0x1c   :  { %846 = vmatprep.subr.bf16.mxu0 %v975_v28 }
  0x1d   :  { %867 = vmatpush3.bf16.msra.mxu1 %v974_v27 }
  0x1e   :  { %868 = vmatprep.subr.bf16.mxu1 %v977_v30 }
  0x1f   :  { %847 = vmatpush3.bf16.msra.mxu0 %v976_v29 }
  0x20   :  { %876 = vmatprep.subr.bf16.mxu0 %v979_v36 }
  0x21   :  { %869 = vmatpush3.bf16.msra.mxu1 %v978_v33 }
  0x22   :  { %493 = vmatmul.mubr.bf16.vlgmr.msra.gmra.mrb[0].mxu0 %v160_v35 }
  0x23   :  { %877 = vmatpush3.bf16.msra.mxu0 %v980_v39  ;;  %572 = vmatprep.mubr.bf16.mxu0 %v165_v53 }
  0x24   :  { %533 = vmatmul.mubr.bf16.vlgmr.msra.gmra.mrb[0].mxu1 %v162_v41  ;;  %878 = vmatprep.subr.bf16.mxu0 %v981_v42 }
  0x27   :  { %879 = vmatpush3.bf16.msra.mxu0 %v982_v43 }
  0x28   :  { %880 = vmatprep.subr.bf16.mxu0 %v983_v44 }
  0x2b   :  { %881 = vmatpush3.bf16.msra.mxu0 %v984_v45 }
  0x2c   :  { %882 = vmatprep.subr.bf16.mxu0 %v985_v46 }
  0x2f   :  { %883 = vmatpush3.bf16.msra.mxu0 %v986_v47 }
  0x30   :  { %884 = vmatprep.subr.bf16.mxu0 %v987_v48 }
  0x33   :  { %885 = vmatpush3.bf16.msra.mxu0 %v988_v49 }
  0x34   :  { %886 = vmatprep.subr.bf16.mxu0 %v989_v50 }
  0x37   :  { %887 = vmatpush3.bf16.msra.mxu0 %v990_v52 }
  0x38   :  { %888 = vmatprep.subr.bf16.mxu0 %v991_v54 }
  0x39   :  { %12 = vsyncpa [#allocation3], 0  ;;  %v994_v57 = vld [vmem:[%s1294_s1 + $0x138] sm:$0xff]   ;;  %v158_v58 = vld [vmem:[%s1293_s0 + $0x20] sm:$0xff]  ;;  %v1031_v61 = vmov 0.0   ;;  %vm1032_vm0 = vmmov 0  }
  0x3a   :  { %v164_v59 = vpack.c.bf16 %v158_v58, %v158_v58  ;;  %v995_v60 = vld [vmem:[%s1296_s3] sm:$0xff]   ;;  %912 = vmatprep.subr.bf16.mxu1 %v1031_v61  ;;  %v996_v62 = vld [vmem:[%s1296_s3 + $0x8] sm:$0xff]   ;;  %v997_v63 = vld [vmem:[%s1296_s3 + $0x10] sm:$0xff]   ;;  %928 = vmatprep.mubr.msk.bf16.mxu1 %vm1032_vm0, %v1031_v61  ;;  %vm708_vm1 = vcmask 523264   ;;  %s1033_s20 = smov [#allocation2]   ;;  %vm752_vm2 = vcmask 64512  }
  0x3b   :  { %889 = vmatpush3.bf16.msra.mxu0 %v992_v55  ;;  %913 = vmatpush3.bf16.msra.mxu1 %v995_v60  ;;  %v998_v0 = vld [vmem:[%s1296_s3 + $0x18] sm:$0xff]   ;;  %v999_v1 = vld [vmem:[%s1296_s3 + $0x20] sm:$0xff]   ;;  %v1000_v2 = vld [vmem:[%s1296_s3 + $0x28] sm:$0xff]  }
  0x3c   :  { %890 = vmatprep.subr.bf16.mxu0 %v993_v56  ;;  %914 = vmatprep.subr.bf16.mxu1 %v1031_v61  ;;  %v1001_v3 = vld [vmem:[%s1296_s3 + $0x30] sm:$0xff]   ;;  %v1002_v4 = vld [vmem:[%s1296_s3 + $0x38] sm:$0xff]   ;;  %v1003_v5 = vld [vmem:[%s1298_s5] sm:$0xff]  }
  0x3d   :  { %v1004_v6 = vld [vmem:[%s1298_s5 + $0x8] sm:$0xff]   ;;  %v768_v8 = vld [vmem:[%s1295_s2] ss:$0 sm:$0xff]  ;;  %v1005_v28 = vld [vmem:[%s1298_s5 + $0x10] sm:$0xff]  }
  0x3e   :  { %v1006_v29 = vld [vmem:[%s1298_s5 + $0x18] sm:$0xff]   ;;  %v817_v30 = vld [vmem:[%s1297_s4] ss:$0 sm:$0xff]  ;;  %s760_s5 = sshll.u32 %s1033_s20, 4  ;;  %s761_s5 = int_to_ptr.vmem [resolvable:$true] %s760_s5 }
  0x3f   :  { %891 = vmatpush3.bf16.msra.mxu0 %v994_v57  ;;  %915 = vmatpush3.bf16.msra.mxu1 %v996_v62  ;;  %v826_v38 = vld [vmem:[%s1299_s6] ss:$0 sm:$0xff]  ;;  %s1007_s4 = scalar_lea.vmem %s761_s5, 128  ;;  %p1012_p1 = scmp.lt.s32.totalorder %s761_s5, %s761_s5 }
  0x40   :  { %932 = vmatprep.subr.bf16.mxu0 %v1031_v61  ;;  %916 = vmatprep.subr.bf16.mxu1 %v1031_v61  ;;  %p1008_p0 = scmp.ne.s32.totalorder %s761_s5, %s1007_s4  ;;  %p1013_p2 = scmp.lt.s32.totalorder %s1007_s4, %s1007_s4 }
  0x42   :  { %573 = vmatmul.mubr.bf16.vlgmr.msra.gmra.mrb[4].mxu0 %v164_v59  ;;  %p1014_p3 = por %p1013_p2, %p1012_p1 }
  0x43   :  { %917 = vmatpush3.bf16.msra.mxu1 %v997_v63  ;;  %940 = vmatprep.mubr.msk.bf16.mxu0 %vm1032_vm0, %v1031_v61 }
  0x44   :  { %918 = vmatprep.subr.bf16.mxu1 %v1031_v61  ;;  %933 = vmatpush3.bf16.msra.mxu0 %v1003_v5  ;;  %p1015_p4 = pnand %p1014_p3, %p1008_p0 }
  0x45   :  { %934 = vmatprep.subr.bf16.mxu0 %v1031_v61 }
  0x47   :  { %919 = vmatpush3.bf16.msra.mxu1 %v998_v0 }
  0x48   :  { %920 = vmatprep.subr.bf16.mxu1 %v1031_v61  ;;  %935 = vmatpush3.bf16.msra.mxu0 %v1004_v6 }
  0x49   :  { %936 = vmatprep.subr.bf16.mxu0 %v1031_v61 }
  0x4b   :  { %921 = vmatpush3.bf16.msra.mxu1 %v999_v1 }
  0x4c   :  { %922 = vmatprep.subr.bf16.mxu1 %v1031_v61  ;;  %937 = vmatpush3.bf16.msra.mxu0 %v1005_v28 }
  0x4d   :  { %938 = vmatprep.subr.bf16.mxu0 %v1031_v61 }
  0x4f   :  { %923 = vmatpush3.bf16.msra.mxu1 %v1000_v2 }
  0x50   :  { %924 = vmatprep.subr.bf16.mxu1 %v1031_v61  ;;  %939 = vmatpush3.bf16.msra.mxu0 %v1006_v29 }
  0x53   :  { %925 = vmatpush3.bf16.msra.mxu1 %v1001_v3 }
  0x54   :  { %926 = vmatprep.subr.bf16.mxu1 %v1031_v61 }
  0x57   :  { %927 = vmatpush3.bf16.msra.mxu1 %v1002_v4 }
  0xf5   :  { %v848_v7 = vpop.f32.mrb[0].mxu0 }
  0xf6   :  { %v849_v9 = vpop.f32.mrb[1].mxu0 }
  0xf7   :  { %v850_v10 = vadd.f32 %v849_v9, %v848_v7  ;;  %v851_v11 = vpop.f32.mrb[2].mxu0  ;;  %v870_v12 = vpop.f32.mrb[0].mxu1 }
  0xf8   :  { %v852_v13 = vpop.f32.mrb[3].mxu0  ;;  %v871_v15 = vpop.f32.mrb[1].mxu1 }
  0xf9   :  { %v495_v14 = vadd.f32 %v850_v10, %v768_v8  ;;  %v872_v16 = vadd.f32 %v871_v15, %v870_v12  ;;  %v873_v17 = vpop.f32.mrb[2].mxu1 }
  0xfa   :  { %v874_v18 = vpop.f32.mrb[3].mxu1 }
  0xfb   :  { %v535_v19 = vadd.f32 %v872_v16, %v495_v14 }
 0x115   :  { %v892_v20 = vpop.f32.mrb[4].mxu0 }
 0x116   :  { %v893_v21 = vpop.f32.mrb[5].mxu0 }
 0x117   :  { %v894_v22 = vadd.f32 %v893_v21, %v892_v20  ;;  %v895_v23 = vpop.f32.mrb[6].mxu0 }
 0x118   :  { %v896_v24 = vpop.f32.mrb[7].mxu0 }
 0x119   :  { %v575_v25 = vadd.f32 %v894_v22, %v535_v19 }
 0x11b   :  { %v580_v26 = vmax.f32 %v575_v25, 0.0 }
 0x11d   :  { %v581_v27 = vpack.c.bf16 %v580_v26, %v580_v26 }
 0x11f   :  { %929 = vmatmul.mubr.bf16.vlgmr.msra.gmra.mrb[4].mxu1 %v581_v27 }
 0x1f2   :  { %v670_v31 = vpop.f32.mrb[4].mxu1 }
 0x1f3   :  { %v671_v32 = vadd.f32 %v817_v30, %v670_v31  ;;  %v930_v33 = vpop.f32.mrb[5].mxu1 }
 0x1f4   :  { %v673_v34 = vpop.f32.mrb[6].mxu1 }
 0x1f5   :  { %v676_v35 = vmax.f32 %v671_v32, 0.0  ;;  %v931_v36 = vpop.f32.mrb[7].mxu1 }
 0x1f7   :  { %v677_v37 = vpack.c.bf16 %v676_v35, %v676_v35 }
 0x1f9   :  { %941 = vmatmul.mubr.msk.bf16.vlgmr.msra.gmra.mrb[8].mxu0 %vm708_vm1, %v677_v37 }
 0x2cc   :  { %v746_v39 = vpop.f32.mrb[8].mxu0 }
 0x2cd   :  { %v747_v40 = vadd.f32 %v826_v38, %v746_v39  ;;  %v942_v41 = vpop.f32.mrb[9].mxu0 }
 0x2ce   :  { %v749_v42 = vpop.f32.mrb[10].mxu0 }
 0x2cf   :  { %v943_v43 = vpop.f32.mrb[11].mxu0  ;;  %753 = vst.msk [vmem:[#allocation2] sm:$0xff] %vm752_vm2, %v747_v40 }
 0x2d0   :  { %1018 = shalt.err (!%p1015_p4)
}
 0x2d1   :  { %s1019_s6 = scalar_lea.hbm %s1300_s7, 128 }
 0x2d2   :  { %p1020_p5 = scmp.ne.s32.totalorder %s1300_s7, %s1019_s6  ;;  %p1023_p6 = scmp.lt.u32.totalorder %s1019_s6, %s1300_s7 }
 0x2d4   :  { %p1025_p7 = pnand %p1023_p6, %p1020_p5 }
 0x2d6   :  { %1028 = shalt.err (!%p1025_p7)
}
 0x2d7   :  { %763 = dma.vmem_to_hbm [thread:$0]  %s761_s5, 128, %s1300_s7, [#allocation3]  }
 0x2d8   :  { %1029 = dma.done.wait [#allocation3], 128  }
 0x2d9   :  { %1030 = vsyncadd [#allocation3], 4294967168 }
 0x2da   :  { %767 = vsyncpa [#allocation3], 1 }

</bundles_post_ra>
